<compile_context>
chip_gen: v6e
topology: v6e:2x2x1
jax: 0.10.0
libtpu: 0.0.40
codegen_flags: <defaults>
</compile_context>

<pallas_src>
import jax
import jax.numpy as jnp
from jax.experimental import pallas as pl
from jax.experimental.pallas import tpu as pltpu

EPS = 1e-3
LANES = 128
SUBLANE_ALIGN = 32  # multiple of 32 sublanes: safe for f32 / bf16 / int8 / fp8 packing


def _device_kind():
    try:
        return jax.devices()[0].device_kind.lower()
    except Exception:
        return ""


def _tile_bytes_for_device(kind):
    # Per-operand input-tile byte budget. 2 inputs x 2 pipeline buffers x budget
    # must fit the generation's default scoped-VMEM limit.
    if any(tag in kind for tag in ("v2", "v3", "v4", "v5")):
        return 2 * 1024 * 1024  # v5e & older: 8 MiB of pipeline buffers < 16 MiB default
    return 4 * 1024 * 1024      # v6e / v7x: 16 MiB of pipeline buffers < 32 MiB default


def _is_v7x(kind):
    return ("v7" in kind) or ("tpu7" in kind)


# ----------------------------- main (tiled) pass -----------------------------

def _charbonnier_partial_kernel(x_ref, y_ref, out_ref):
    # Widen in-register; HBM traffic stays at the input dtype width.
    d = x_ref[...].astype(jnp.float32) - y_ref[...].astype(jnp.float32)
    c = jnp.sqrt(d * d + jnp.float32(EPS * EPS))
    # Fold this tile's rows into one vreg-shaped (8, 128) partial sum: the
    # reshape groups whole (8, 128) vregs, so this is pure VPU adds.
    out_ref[...] = jnp.sum(c.reshape(-1, 8, LANES), axis=0)


def _charbonnier_main_sum(x2, y2, tile_rows, vmem_limit):
    """Sum of sqrt((x-y)^2 + eps^2) over a (rows, 128) slab; rows % tile_rows == 0."""
    rows = x2.shape[0]
    num_tiles = rows // tile_rows
    elements = rows * LANES
    partials = pl.pallas_call(
        _charbonnier_partial_kernel,
        out_shape=jax.ShapeDtypeStruct((num_tiles * 8, LANES), jnp.float32),
        grid_spec=pltpu.PrefetchScalarGridSpec(
            num_scalar_prefetch=0,
            grid=(num_tiles,),
            in_specs=[
                pl.BlockSpec((tile_rows, LANES), lambda i: (i, 0)),
                pl.BlockSpec((tile_rows, LANES), lambda i: (i, 0)),
            ],
            out_specs=pl.BlockSpec((8, LANES), lambda i: (i, 0)),
        ),
        cost_estimate=pl.CostEstimate(
            flops=4 * elements,
            transcendentals=elements,
            bytes_accessed=2 * elements * x2.dtype.itemsize + num_tiles * 8 * LANES * 4,
        ),
        compiler_params=pltpu.CompilerParams(
            # Independent per-tile partials -> shardable across TensorCores (v7x).
            dimension_semantics=("parallel",),
            vmem_limit_bytes=vmem_limit,
        ),
    )(x2, y2)
    # Tiny final reduction over (num_tiles * 8, 128) partials.
    return jnp.sum(partials, dtype=jnp.float32)


# ------------------------------- tail pass ------------------------------------

def _charbonnier_tail_kernel(x_ref, y_ref, out_ref):
    d = x_ref[...].astype(jnp.float32) - y_ref[...].astype(jnp.float32)
    c = jnp.sqrt(d * d + jnp.float32(EPS * EPS))
    out_ref[...] = jnp.sum(c, axis=0, keepdims=True)


def _charbonnier_tail_sum(x2, y2, vmem_limit):
    """Single-block pass over the leftover full 128-lane rows (< one main tile)."""
    rows = x2.shape[0]
    elements = rows * LANES
    partial = pl.pallas_call(
        _charbonnier_tail_kernel,
        out_shape=jax.ShapeDtypeStruct((1, LANES), jnp.float32),
        cost_estimate=pl.CostEstimate(
            flops=4 * elements,
            transcendentals=elements,
            bytes_accessed=2 * elements * x2.dtype.itemsize + LANES * 4,
        ),
        compiler_params=pltpu.CompilerParams(vmem_limit_bytes=vmem_limit),
    )(x2, y2)
    return jnp.sum(partial, dtype=jnp.float32)


# -------------------------------- wrapper --------------------------------------

def l1_charbonnier_loss(x, y):
    assert x.shape == y.shape, (x.shape, y.shape)
    n = x.size
    xf = x.reshape(-1)
    yf = y.reshape(-1)

    kind = _device_kind()
    itemsize = jnp.dtype(x.dtype).itemsize
    tile_bytes = _tile_bytes_for_device(kind)
    # Headroom for compiler temporaries when using the big (4 MiB/operand) tiles.
    vmem_limit = 48 * 1024 * 1024 if tile_bytes >= 4 * 1024 * 1024 else None

    m_total = n // LANES                                   # full 128-lane rows
    m32 = (m_total // SUBLANE_ALIGN) * SUBLANE_ALIGN       # 32-sublane-aligned prefix

    # Dtype-aware byte budget -> row count (multiple of 32 sublanes).
    budget_rows = max(
        SUBLANE_ALIGN,
        (tile_bytes // (LANES * itemsize)) // SUBLANE_ALIGN * SUBLANE_ALIGN,
    )
    tile_rows = min(budget_rows, m32)

    # v7x only: keep both TensorCores busy -> ensure >= 2 "parallel" grid steps.
    if (_is_v7x(kind) and tile_rows >= SUBLANE_ALIGN
            and m32 >= 2 * SUBLANE_ALIGN and m32 // tile_rows < 2):
        tile_rows = max(SUBLANE_ALIGN, (m32 // 2) // SUBLANE_ALIGN * SUBLANE_ALIGN)

    total = jnp.float32(0.0)
    rows_main = 0
    if tile_rows >= SUBLANE_ALIGN:
        num_tiles = m32 // tile_rows
        rows_main = num_tiles * tile_rows
        x2 = xf[: rows_main * LANES].reshape(rows_main, LANES)
        y2 = yf[: rows_main * LANES].reshape(rows_main, LANES)
        total = total + _charbonnier_main_sum(x2, y2, tile_rows, vmem_limit)

    # Remaining full 128-lane rows: one tiny single-block Pallas pass.
    rows_tail = m_total - rows_main
    if rows_tail > 0:
        lo, hi = rows_main * LANES, m_total * LANES
        xt = xf[lo:hi].reshape(rows_tail, LANES)
        yt = yf[lo:hi].reshape(rows_tail, LANES)
        total = total + _charbonnier_tail_sum(xt, yt, vmem_limit)

    # Final < 128 elements: negligible, exact, plain JAX.
    if m_total * LANES < n:
        dt = (xf[m_total * LANES:].astype(jnp.float32)
              - yf[m_total * LANES:].astype(jnp.float32))
        total = total + jnp.sum(jnp.sqrt(dt * dt + jnp.float32(EPS * EPS)))

    return total / jnp.float32(n)


def _reference(x, y):
    # NOTE: the T-SR module adds epsilon**2 (= 1e-6) under the sqrt; we match that.
    return jnp.mean(jnp.sqrt((x - y) ** 2 + jnp.float32(EPS) ** 2))


if __name__ == "__main__":
    key = jax.random.PRNGKey(0)

    # Shapes chosen to exercise all three paths:
    #   (2, 4, 16, 16)  -> tail-kernel-only path (16 full rows, no 32-aligned prefix)
    #   (2, 3, 64, 64)  -> main tiled kernel path (192 rows, 32-aligned)
    #   (1, 1, 70, 70)  -> main + tail + <128-element plain-JAX residue
    shapes = [(2, 4, 16, 16), (2, 3, 64, 64), (1, 1, 70, 70)]

    ok = True
    for shp in shapes:
        key, kx, ky = jax.random.split(key, 3)
        x = jax.random.normal(kx, shp, dtype=jnp.float32)
        y = jax.random.normal(ky, shp, dtype=jnp.float32)

        loss = jax.block_until_ready(l1_charbonnier_loss(x, y))
        ref = _reference(x, y)
        if not jnp.allclose(loss, ref, rtol=1e-5, atol=1e-6):
            ok = False
            print("MISMATCH", shp, float(loss), float(ref))

    if ok:
        print("KERNEL_OK")
</pallas_src>

<mosaic_0001>
module attributes {stable_mosaic.version = 11 : i64} {
  func.func @_charbonnier_tail_kernel(%arg0: memref<16x128xf32, #tpu.memory_space<vmem>>, %arg1: memref<16x128xf32, #tpu.memory_space<vmem>>, %arg2: memref<1x128xf32, #tpu.memory_space<vmem>>) attributes {dimension_semantics = [], scalar_prefetch = 0 : i64, scratch_operands = 0 : i64, tpu.core_type = #tpu.core_type<tc>} {
    %c0 = arith.constant 0 : index
    %c0_0 = arith.constant 0 : index
    %0 = vector.load %arg0[%c0, %c0_0] : memref<16x128xf32, #tpu.memory_space<vmem>>, vector<16x128xf32>
    %c0_1 = arith.constant 0 : index
    %c0_2 = arith.constant 0 : index
    %1 = vector.load %arg1[%c0_1, %c0_2] : memref<16x128xf32, #tpu.memory_space<vmem>>, vector<16x128xf32>
    %2 = arith.subf %0, %1 : vector<16x128xf32>
    %3 = arith.mulf %2, %2 : vector<16x128xf32>
    %cst = arith.constant 9.99999997E-7 : f32
    %4 = vector.broadcast %cst : f32 to vector<16x128xf32>
    %5 = arith.addf %3, %4 : vector<16x128xf32>
    %6 = math.sqrt %5 : vector<16x128xf32>
    %cst_3 = arith.constant dense<0.000000e+00> : vector<128xf32>
    %7 = vector.multi_reduction <add>, %6, %cst_3 [0] : vector<16x128xf32> to vector<128xf32>
    %8 = vector.shape_cast %7 : vector<128xf32> to vector<1x128xf32>
    %c0_4 = arith.constant 0 : index
    %c0_5 = arith.constant 0 : index
    %9 = vector.load %arg2[%c0_4, %c0_5] : memref<1x128xf32, #tpu.memory_space<vmem>>, vector<1x128xf32>
    tpu.vector_store %arg2[%c0_4, %c0_5], %8 {strides = array<i32>} : memref<1x128xf32, #tpu.memory_space<vmem>>, vector<1x128xf32>,
    return
  }
}

</mosaic_0001>

<bundles_post_ra>
// kernel: tpu_custom_call.1
= control target key start
LH: loop header
LB: loop body
LE: loop exit
PB: predicated region body
PF: predicated region fallthrough
CT: control target
= control target key end

     0   :  { %7 = vsyncpa [#allocation3], 0  ;;  %s192_s0 = inlined_call_operand.hbm [shape: f32[16,128], index: 0, kind: input, shape index: {}]   ;;  %s193_s1 = inlined_call_operand.hbm [shape: f32[16,128], index: 1, kind: input, shape index: {}]   ;;  %s194_s2 = inlined_call_operand.hbm [shape: f32[1,128], index: 2, kind: output, shape index: {}]  }
   0x1   :  { %8 = vsyncpa [#allocation6], 0 }
   0x2   :  { %9 = vsyncpa [#allocation4], 0  ;;  %s163_s9 = smov [#allocation2]  }
   0x3   :  { %s15_s10 = sshll.u32 %s163_s9, 4  ;;  %s16_s10 = int_to_ptr.vmem [resolvable:$true] %s15_s10 }
   0x4   :  { %s105_s11 = scalar_lea.vmem %s16_s10, 256  ;;  %p110_p1 = scmp.lt.s32.totalorder %s16_s10, %s16_s10 }
   0x5   :  { %p106_p0 = scmp.ne.s32.totalorder %s16_s10, %s105_s11  ;;  %p111_p2 = scmp.lt.s32.totalorder %s105_s11, %s105_s11 }
   0x7   :  { %p112_p3 = por %p111_p2, %p110_p1 }
   0x9   :  { %p113_p4 = pnand %p112_p3, %p106_p0 }
   0xb   :  { %116 = shalt.err (!%p113_p4)
}
   0xc   :  { %s164_s12 = smov 128   ;;  %s165_s13 = smov 8  }
   0xd   :  { %21 = dma.hbm_to_vmem [thread:$0]  %s192_s0, 256, %s16_s10, [#allocation3], %s164_s12, %s164_s12, %s165_s13  }
   0xe   :  { %s166_s16 = smov [#allocation5]  }
   0xf   :  { %s27_s17 = sshll.u32 %s166_s16, 4  ;;  %s28_s17 = int_to_ptr.vmem [resolvable:$true] %s27_s17 }
  0x10   :  { %s125_s18 = scalar_lea.vmem %s28_s17, 256  ;;  %p130_p6 = scmp.lt.s32.totalorder %s28_s17, %s28_s17 }
  0x11   :  { %p126_p5 = scmp.ne.s32.totalorder %s28_s17, %s125_s18  ;;  %p131_p7 = scmp.lt.s32.totalorder %s125_s18, %s125_s18 }
  0x13   :  { %p132_p8 = por %p131_p7, %p130_p6 }
  0x15   :  { %p133_p9 = pnand %p132_p8, %p126_p5 }
  0x17   :  { %136 = shalt.err (!%p133_p9)
}
  0x18   :  { %33 = dma.hbm_to_vmem [thread:$0]  %s193_s1, 256, %s28_s17, [#allocation6], %s164_s12, %s164_s12, %s165_s13  }
  0x19   :  { %157 = dma.done.wait [#allocation3], 256  }
  0x1a   :  { %158 = vsyncadd [#allocation3], 4294967040 }
  0x1b   :  { %159 = dma.done.wait [#allocation6], 256  }
  0x1c   :  { %160 = vsyncadd [#allocation6], 4294967040  ;;  %v40_v0 = vld [vmem:[#allocation2] sm:$0xff]  ;;  %v41_v1 = vld [vmem:[#allocation2 + $0x8] sm:$0xff]  ;;  %s167_s0 = smov [#allocation7]  }
  0x1d   :  { %v42_v2 = vld [vmem:[#allocation5] sm:$0xff]  ;;  %v43_v3 = vld [vmem:[#allocation5 + $0x8] sm:$0xff]  ;;  %s78_s1 = sshll.u32 %s167_s0, 4  ;;  %s79_s1 = int_to_ptr.vmem [resolvable:$true] %s78_s1 }
  0x1e   :  { %v44_v4 = vsub.f32 %v40_v0, %v42_v2  ;;  %v45_v5 = vsub.f32 %v41_v1, %v43_v3  ;;  %s137_s21 = scalar_lea.vmem %s79_s1, 16  ;;  %s141_s22 = scalar_lea.vmem %s79_s1, 32 }
  0x1f   :  { %p138_p10 = scmp.ne.s32.totalorder %s79_s1, %s137_s21  ;;  %p142_p11 = scmp.lt.s32.totalorder %s79_s1, %s79_s1 }
  0x20   :  { %v46_v6 = vmul.f32 %v44_v4, %v44_v4  ;;  %v47_v7 = vmul.f32 %v45_v5, %v45_v5  ;;  %p143_p12 = scmp.lt.s32.totalorder %s141_s22, %s137_s21 }
  0x22   :  { %v48_v8 = vadd.f32 1e-06, %v46_v6  ;;  %v49_v9 = vadd.f32 1e-06, %v47_v7  ;;  %p144_p13 = por %p143_p12, %p142_p11 }
  0x24   :  { %93 = vrsqrt.f32 %v48_v8  ;;  %vm52_vm0 = vcmp.eq.f32.partialorder %v48_v8, inf  ;;  %v55_v11 = vand.u32 2147483648, %v48_v8  ;;  %vm54_vm1 = vcmp.eq.f32.partialorder %v48_v8, 0.0  ;;  %p145_p0 = pnand %p144_p13, %p138_p10 }
  0x25   :  { %95 = vrsqrt.f32 %v49_v9  ;;  %vm59_vm2 = vcmp.eq.f32.partialorder %v49_v9, inf  ;;  %v62_v14 = vand.u32 2147483648, %v49_v9  ;;  %vm61_vm3 = vcmp.eq.f32.partialorder %v49_v9, 0.0 }
  0x31   :  { %v94_v10 = vpop.eup %93 }
  0x32   :  { %v96_v12 = vpop.eup %95  ;;  %v51_v13 = vmul.f32 %v94_v10, %v48_v8 }
  0x33   :  { %v58_v15 = vmul.f32 %v96_v12, %v49_v9 }
  0x34   :  { %v53_v16 = vsel %vm52_vm0, %v48_v8, %v51_v13 }
  0x35   :  { %v56_v17 = vsel %vm54_vm1, %v55_v11, %v53_v16  ;;  %v60_v18 = vsel %vm59_vm2, %v49_v9, %v58_v15 }
  0x36   :  { %v63_v19 = vsel %vm61_vm3, %v62_v14, %v60_v18 }
  0x37   :  { %v64_v20 = vadd.f32 %v63_v19, %v56_v17 }
  0x39   :  { %v65_v21 = vrot.slane %v64_v20, 4 }
  0x3b   :  { %v66_v22 = vadd.f32 %v65_v21, %v64_v20 }
  0x3d   :  { %v67_v23 = vrot.slane %v66_v22, 2 }
  0x3f   :  { %v68_v24 = vadd.f32 %v67_v23, %v66_v22 }
  0x41   :  { %v69_v25 = vrot.slane %v68_v24, 1 }
  0x43   :  { %v70_v26 = vadd.f32 %v69_v25, %v68_v24 }
  0x45   :  { %71 = vst [vmem:[#allocation7] sm:$0x1] %v70_v26 }
  0x46   :  { %148 = shalt.err (!%p145_p0)
}
  0x47   :  { %81 = dma.vmem_to_hbm [thread:$0]  %s79_s1, 16, %s194_s2, [#allocation4]  }
  0x48   :  { %161 = dma.done.wait [#allocation4], 16  }
  0x49   :  { %162 = vsyncadd [#allocation4], 4294967280 }
  0x4a   :  { %85 = vsyncpa [#allocation3], 1 }
  0x4b   :  { %86 = vsyncpa [#allocation6], 1 }
  0x4c   :  { %87 = vsyncpa [#allocation4], 1 }

</bundles_post_ra>
